<compile_context>
chip_gen: v7x
topology: tpu7x:2x2x1
jax: 0.10.0
libtpu: 0.0.40
codegen_flags: <defaults>
</compile_context>

<pallas_src>
import functools

import jax
import jax.numpy as jnp
from jax import lax
from jax.experimental import pallas as pl
from jax.experimental.pallas import tpu as pltpu


def _bimap_groups_kernel(x_ref, w_ref, o_ref):
    """One grid point = one (batch b, group g); all S segments in the block.

    x_ref: (S, n, n) tile of X[b, g]
    w_ref: (S, n, m) tile of W[g]
    o_ref: (m, m)   tile of out[b, g]
    """
    x = x_ref[...]                       # (S, n, n)
    w = w_ref[...]                       # (S, n, m)
    S, n, m = w.shape                    # static at trace time

    # Stage 1: Y[s] = X[s] @ W[s]  -- batched over s on the MXU.
    #   y[s, i, j] = sum_k x[s, i, k] * w[s, k, j]
    y = lax.dot_general(
        x, w,
        dimension_numbers=(((2,), (1,)), ((0,), (0,))),
        preferred_element_type=jnp.float32)          # (S, n, m) f32

    # Stage 2: P = sum_s W[s]^T Y[s] == W_flat^T @ Y_flat with K = S*n.
    # Contract on axis 0 of both operands -> no materialized transpose.
    wf = w.reshape(S * n, m).astype(jnp.float32)     # (S*n, m)
    yf = y.reshape(S * n, m)                         # (S*n, m)
    p = lax.dot_general(
        wf, yf,
        dimension_numbers=(((0,), (0,)), ((), ())),
        preferred_element_type=jnp.float32)          # (m, m)

    o_ref[...] = p.astype(o_ref.dtype)


@functools.partial(jax.jit, static_argnames=())
def bimap_groups_pallas(X, W):
    """X: (B, G, S, n, n), W: (G, S, n, m) -> (B, G, m, m)."""
    B, G, S, n, n2 = X.shape
    assert n == n2
    Gw, Sw, nw, m = W.shape
    assert (Gw, Sw, nw) == (G, S, n)

    grid = (B, G)
    return pl.pallas_call(
        _bimap_groups_kernel,
        out_shape=jax.ShapeDtypeStruct((B, G, m, m), X.dtype),
        grid_spec=pltpu.PrefetchScalarGridSpec(
            num_scalar_prefetch=0,
            grid=grid,
            in_specs=[
                # X tile: squeeze (b, g), bring all S segments + full (n, n).
                pl.BlockSpec((None, None, S, n, n),
                             lambda b, g: (b, g, 0, 0, 0)),
                # W tile: squeeze g, all S segments + full (n, m).
                pl.BlockSpec((None, S, n, m),
                             lambda b, g: (g, 0, 0, 0)),
            ],
            out_specs=pl.BlockSpec((None, None, m, m),
                                   lambda b, g: (b, g, 0, 0)),
        ),
        compiler_params=pltpu.CompilerParams(
            # B*G independent work items; splits evenly across megacore TCs.
            dimension_semantics=("parallel", "parallel")),
    )(X, W)


def spd_increase_dim(X, ni, no):
    """Plain-JAX glue equivalent of SPDIncreaseDim: (*, ni, ni) -> (*, no, no)."""
    eye = jnp.eye(no, ni, dtype=X.dtype)                      # (no, ni)
    add = jnp.diag(jnp.concatenate(
        [jnp.zeros((ni,), X.dtype), jnp.ones((no - ni,), X.dtype)]))
    return add + jnp.einsum('ij,...jk,lk->...il', eye, X, eye)


class BiMapGroupsPallas:
    """Synthetic (deterministically initialized) BiMapGroups."""

    def __init__(self, groups, segments, ni, no, key):
        self._groups = groups
        self._segments = segments
        self._ni_in = ni
        self._no = no
        self._ni = max(ni, no)   # after optional SPDIncreaseDim
        # Deterministic Stiefel init: per-(g,s) QR of a random gaussian,
        # giving column-orthonormal (ni, no) matrices (analogue of
        # nn.init.orthogonal_ on a CanonicalStiefel ManifoldParameter).
        # TODO(synk): the geoopt Riemannian-manifold structure itself has no
        # Pallas equivalent; only the forward pass is implemented here.
        raw = jax.random.normal(key, (groups, segments, self._ni, self._no),
                                dtype=jnp.float32)
        q, _ = jnp.linalg.qr(raw)            # (G, S, ni, no), batched QR
        self.W = q

    def __call__(self, X):
        # X: (B, groups, segments, ni, ni)
        if self._no > self._ni_in:
            X = spd_increase_dim(X, self._ni_in, self._no)
        return bimap_groups_pallas(X, self.W)


def _reference(X, W, ni_in, no):
    if no > ni_in:
        X = spd_increase_dim(X, ni_in, no)
    # sum over segments of W^T X W
    return jnp.einsum('gsni,bgsnk,gskm->bgim', W, X, W)


if __name__ == "__main__":
    key = jax.random.PRNGKey(0)
    k_w, k_x = jax.random.split(key)

    batch, groups, segments, ni, no = 2, 4, 8, 16, 8

    module = BiMapGroupsPallas(groups, segments, ni, no, k_w)

    # Build SPD inputs: X = A A^T (per (b, g, s)).
    A = jax.random.normal(k_x, (batch, groups, segments, ni, ni),
                          dtype=jnp.float32)
    X = jnp.einsum('bgsij,bgskj->bgsik', A, A)

    out = module(X)
    out = jax.block_until_ready(out)

    ref = _reference(X, module.W, ni, no)
    assert out.shape == (batch, groups, no, no), out.shape
    assert jnp.allclose(out, ref, rtol=1e-4, atol=1e-3), \
        float(jnp.max(jnp.abs(out - ref)))

    print("KERNEL_OK")
</pallas_src>

<mosaic_0001>
module attributes {stable_mosaic.version = 11 : i64} {
  func.func @_bimap_groups_kernel(%arg0: i32, %arg1: i32, %arg2: memref<1x1x8x16x16xf32, #tpu.memory_space<vmem>>, %arg3: memref<1x8x16x8xf32, #tpu.memory_space<vmem>>, %arg4: memref<1x1x8x8xf32, #tpu.memory_space<vmem>>) attributes {dimension_semantics = [#tpu.dimension_semantics<parallel>, #tpu.dimension_semantics<parallel>], iteration_bounds = array<i64: 2, 4>, scalar_prefetch = 0 : i64, scratch_operands = 0 : i64, tpu.core_type = #tpu.core_type<tc>, window_params = [{transform_indices = @transform_0, window_bounds = array<i64: 1, 1, 8, 16, 16>}, {transform_indices = @transform_1, window_bounds = array<i64: 1, 8, 16, 8>}, {transform_indices = @transform_2, window_bounds = array<i64: 1, 1, 8, 8>}]} {
    %c0 = arith.constant 0 : index
    %c0_0 = arith.constant 0 : index
    %c0_1 = arith.constant 0 : index
    %c0_2 = arith.constant 0 : index
    %c0_3 = arith.constant 0 : index
    %0 = vector.load %arg2[%c0, %c0_0, %c0_1, %c0_2, %c0_3] : memref<1x1x8x16x16xf32, #tpu.memory_space<vmem>>, vector<1x1x8x16x16xf32>
    %1 = vector.shape_cast %0 : vector<1x1x8x16x16xf32> to vector<8x16x16xf32>
    %c0_4 = arith.constant 0 : index
    %c0_5 = arith.constant 0 : index
    %c0_6 = arith.constant 0 : index
    %c0_7 = arith.constant 0 : index
    %2 = vector.load %arg3[%c0_4, %c0_5, %c0_6, %c0_7] : memref<1x8x16x8xf32, #tpu.memory_space<vmem>>, vector<1x8x16x8xf32>
    %3 = vector.shape_cast %2 : vector<1x8x16x8xf32> to vector<8x16x8xf32>
    %cst = arith.constant dense<0.000000e+00> : vector<8x16x8xf32>
    %4 = tpu.matmul %1, %3, %cst {dimension_numbers = #tpu.dot_dimension_numbers<[2], [1], [1], [2], [0, 0, 0, 1, 1, 2], [0], [0]>} : vector<8x16x16xf32>, vector<8x16x8xf32>, vector<8x16x8xf32> -> vector<8x16x8xf32>
    %5 = vector.shape_cast %3 : vector<8x16x8xf32> to vector<128x8xf32>
    %6 = vector.shape_cast %4 : vector<8x16x8xf32> to vector<128x8xf32>
    %cst_8 = arith.constant dense<0.000000e+00> : vector<8x8xf32>
    %7 = tpu.matmul %5, %6, %cst_8 {dimension_numbers = #tpu.dot_dimension_numbers<[0], [0], [1], [1], [0, 1, 1, 1], [], []>} : vector<128x8xf32>, vector<128x8xf32>, vector<8x8xf32> -> vector<8x8xf32>
    %c0_9 = arith.constant 0 : index
    %c0_10 = arith.constant 0 : index
    %c0_11 = arith.constant 0 : index
    %c0_12 = arith.constant 0 : index
    %8 = vector.load %arg4[%c0_9, %c0_10, %c0_11, %c0_12] : memref<1x1x8x8xf32, #tpu.memory_space<vmem>>, vector<1x1x8x8xf32>
    %9 = vector.shape_cast %8 : vector<1x1x8x8xf32> to vector<8x8xf32>
    %10 = vector.shape_cast %7 : vector<8x8xf32> to vector<1x1x8x8xf32>
    tpu.vector_store %arg4[%c0_9, %c0_10, %c0_11, %c0_12], %10 {strides = array<i32>} : memref<1x1x8x8xf32, #tpu.memory_space<vmem>>, vector<1x1x8x8xf32>,
    return
  }
  func.func @transform_0(%arg0: i32, %arg1: i32) -> (i32, i32, i32, i32, i32) {
    %c0_i32 = arith.constant 0 : i32
    %c0_i32_0 = arith.constant 0 : i32
    %c0_i32_1 = arith.constant 0 : i32
    %c0_i32_2 = arith.constant 0 : i32
    return %arg0, %arg1, %c0_i32, %c0_i32_0, %c0_i32_1 : i32, i32, i32, i32, i32
  }
  func.func @transform_1(%arg0: i32, %arg1: i32) -> (i32, i32, i32, i32) {
    %c0_i32 = arith.constant 0 : i32
    %c0_i32_0 = arith.constant 0 : i32
    %c0_i32_1 = arith.constant 0 : i32
    %c0_i32_2 = arith.constant 0 : i32
    return %arg1, %c0_i32, %c0_i32_0, %c0_i32_1 : i32, i32, i32, i32
  }
  func.func @transform_2(%arg0: i32, %arg1: i32) -> (i32, i32, i32, i32) {
    %c0_i32 = arith.constant 0 : i32
    %c0_i32_0 = arith.constant 0 : i32
    %c0_i32_1 = arith.constant 0 : i32
    return %arg0, %arg1, %c0_i32, %c0_i32_0 : i32, i32, i32, i32
  }
}

</mosaic_0001>

<bundles_post_ra>
// kernel: bimap_groups_pallas.1
= control target key start
LH: loop header
LB: loop body
LE: loop exit
PB: predicated region body
PF: predicated region fallthrough
CT: control target
= control target key end

     0   :  { %7 = vsyncpa [#allocation3], 0  ;;  %s1816_s0 = inlined_call_operand.hbm [shape: f32[2,4,8,16,16], index: 0, kind: input, shape index: {}]   ;;  %s1817_s1 = inlined_call_operand.vmem [shape: f32[4,8,16,8], index: 1, kind: input, shape index: {}]   ;;  %s1818_s2 = inlined_call_operand.hbm [shape: f32[2,4,8,8], index: 2, kind: output, shape index: {}]  }
   0x1   :  { %9 = vsyncpa [#allocation3 + $0x1], 0 }
   0x2   :  { %10 = vsyncpa [#allocation4], 0 }
   0x3   :  { %12 = vsyncpa [#allocation4 + $0x1], 0  ;;  %s1565_s9 = smov 0   ;;  %s1567_s10 = smov 0  }
   0x4   :  { %s1569_s11 = smov 0   ;;  %s1571_s12 = smov 0  }
   0x5   :  { %s1573_s13 = smov 0   ;;  %s1575_s14 = smov 0  }
   0x6   :  { %s1577_s15 = smov 0   ;;  %s1579_s16 = smov 0  }
   0x7 LB: > { %s1099_s17 = sadd.s32 4294967295, %s1541_s16   ;;  %s1100_s18 = sadd.s32 4294967294, %s1541_s16   ;;  %s1541_s16 = sphi %s1579_s16, %s18_s16   ;;  %s1537_s15 = sphi %s1577_s15, %s1833_s15   ;;  %s1533_s14 = sphi %s1575_s14, %s1832_s14   ;;  %s1529_s13 = sphi %s1573_s13, %s1831_s13   ;;  %s1525_s12 = sphi %s1571_s12, %s1830_s12   ;;  %s1521_s11 = sphi %s1569_s11, %s1829_s11   ;;  %s1517_s10 = sphi %s1567_s10, %s1828_s10   ;;  %s1513_s9 = sphi %s1565_s9, %s1827_s9  }
   0x8   : > { %s27_s19 = sadd.s32 1, %s1533_s14  ;;  %s30_s20 = sadd.s32 1, %s1537_s15 }
   0x9   : > { %p28_p0 = scmp.ge.s32.totalorder %s27_s19, 4  ;;  %s39_s21 = sadd.s32 1, %s1521_s11 }
   0xa   : > { %p46_p1 = scmp.ne.s32.totalorder %s1521_s11, %s1517_s10  ;;  %p47_p2 = scmp.eq.s32.totalorder %s1541_s16, 0 }
   0xb   : > { %s1835_s19 = smov (%p28_p0, %s27_s19), 0  ;;  %s1837_s20 = smov (!%p28_p0, %s30_s20), %s1537_s15 }
   0xc   : > { %s35_s22 = ssub.s32 %s1533_s14, %s1835_s19  ;;  %p1618_p3 = por %p47_p2, %p46_p1 }
   0xd   : > { %p32_p4 = scmp.ge.s32.totalorder %s1837_s20, 2  ;;  %p52_p5 = scmp.ne.s32.totalorder %s1517_s10, %s1513_s9 }
   0xe   : > { %p53_p6 = scmp.eq.s32.totalorder %s1099_s17, 0  ;;  %p104_p7 = scmp.eq.s32.totalorder %s1099_s17, 7 }
   0xf   : > { %s1839_s20 = smov (%p32_p4, %s1837_s20), 0  ;;  %p110_p10 = scmp.eq.s32.totalorder %s1100_s18, 7 }
  0x10   : > { %p1626_p8 = por %p53_p6, %p52_p5  ;;  %p1630_p9 = por %p104_p7, %p46_p1 }
  0x11   : > { %s34_s26 = ssub.s32 %s1537_s15, %s1839_s20  ;;  %p1636_p12 = por %p110_p10, %p52_p5 }
  0x12   : > { %s1822_s25 = scalar_select %p1630_p9, 1, 0 }
  0x13   : > { %s36_s27 = sor.u32 %s35_s22, %s34_s26  ;;  %p1342_p13 = scmp.lt.s32.totalorder %s1541_s16, 8 }
  0x14   : > { %p37_p11 = scmp.eq.s32.totalorder %s36_s27, 0  ;;  %s130_s29 = sand.u32 1, %s1521_s11  }
  0x15   : > { %s1823_s28 = scalar_select %p1636_p12, 1, 0 }
  0x16   : > { %s1643_s30 = scalar_select %p37_p11, %s1521_s11, %s39_s21  }
  0x17   : > { %s1103_s3 = sshll.u32 %s130_s29, 7  ;;  %s1104_s4 = sshll.u32 %s1533_s14, 4 }
  0x18   : > { %s1105_s5 = sshll.u32 %s1537_s15, 6  ;;  %s134_s6 = scalar_lea.vmem [#allocation2], %s1103_s3 }
  0x19   : > { %s143_s7 = sshll.u32 %s134_s6, 4  ;;  %s140_s8 = sadd.s32 %s1105_s5, %s1104_s4  ;;  %s1647_s7 = int_to_ptr.vmem [resolvable:$true] %s143_s7 }
  0x1a   : > { %s1106_s17 = sshll.u32 %s140_s8, 7  ;;  %p1651_p0 = pnand %p1342_p13, %p1618_p3 }
  0x1b   : > { %s1658_s21 = scalar_lea.hbm %s1816_s0, %s1106_s17  ;;  %s1660_s27 = scalar_lea.sflag [#allocation3], %s130_s29 }
  0x1c   : > { %s1413_s3 = scalar_lea.hbm %s1658_s21, 2048  ;;  %p1415_p2 = pneg %p1651_p0 }
  0x1d   : > { %p1414_p1 = scmp.ne.s32.totalorder %s1658_s21, %s1413_s3  ;;  %s1418_s5 = scalar_lea.hbm %s1816_s0, 16384 }
  0x1e   : > { %p1419_p5 = scmp.lt.u32.totalorder %s1658_s21, %s1816_s0  ;;  %p1420_p6 = scmp.lt.u32.totalorder %s1418_s5, %s1413_s3 }
  0x1f   : > { %p1416_p3 = pnand %p1415_p2, %p1414_p1  ;;  %p1422_p10 = scmp.lt.u32.totalorder %s1413_s3, %s1658_s21 }
  0x20   : > { %p1421_p7 = por %p1420_p6, %p1419_p5 }
  0x21   : > { %p1417_p4 = pneg %p1416_p3 }
  0x22   : > { %p1423_p11 = por %p1422_p10, %p1421_p7 }
  0x24   : > { %p1424_p13 = pnand %p1423_p11, %p1417_p4 }
  0x26   : > { %1427 = shalt.err (!%p1424_p13)
}
  0x27   : > { %s1428_s29 = scalar_lea.vmem %s1647_s7, 2048  ;;  %s1543_s17 = smov [#allocation2]  }
  0x28   : > { %p1429_p1 = scmp.ne.s32.totalorder %s1647_s7, %s1428_s29  ;;  %s1433_s22 = sshll.u32 %s1543_s17, 4  ;;  %s1434_s22 = int_to_ptr.vmem [resolvable:$false] %s1433_s22 }
  0x29   : > { %s1435_s26 = scalar_lea.vmem %s1434_s22, 4096  ;;  %p1436_p9 = scmp.lt.s32.totalorder %s1647_s7, %s1434_s22 }
  0x2a   : > { %p1431_p3 = pnand %p1429_p1, %p1415_p2  ;;  %p1437_p5 = scmp.lt.s32.totalorder %s1435_s26, %s1428_s29 }
  0x2c   : > { %p1432_p12 = pneg %p1431_p3  ;;  %p1438_p6 = por %p1437_p5, %p1436_p9 }
  0x2e   : > { %p1439_p7 = pnand %p1438_p6, %p1432_p12 }
  0x30   : > { %1442 = shalt.err (!%p1439_p7)
}
  0x31   : > { %s1544_s3 = smov 128   ;;  %s1545_s23 = smov 8  }
  0x32   : > { %1337 = dma.hbm_to_vmem [thread:$0]  (!%p1651_p0), %s1658_s21, 2048, %s1647_s7, %s1660_s27, %s1544_s3, %s1544_s3, %s1545_s23  }
  0x33   : > { %p1107_p2 = scmp.ge.s32.totalorder %s1541_s16, 1  ;;  %p159_p4 = scmp.lt.s32.totalorder %s1541_s16, 9 }
  0x35   : > { %p160_p10 = pnand %p1107_p2, %p159_p4 }
  0x36   : > { %s1691_s4 = sand.u32 (!%p160_p10), 1, %s1517_s10  }
  0x37   : > { %163 = sbr.rel (%p160_p10) target bundleno = 548 (0x224), region = 28  ;;  %s1108_s5 = sshll.u32 (!%p160_p10), %s1691_s4, 7 }
  0x38   : > { %s166_s6 = scalar_lea.sflag (!%p160_p10), [#allocation3], %s1691_s4  ;;  %s1695_s8 = scalar_lea.vmem (!%p160_p10), [#allocation2], %s1108_s5 }
  0x3e   : > { %1504 = dma.done.wait (%p1626_p8), %s166_s6, 2048  }
  0x3f   : > { %1506 = vsyncadd (%p1626_p8), %s166_s6, 4294965248  ;;  %p195_p9 = scmp.lt.s32.totalorder %s1525_s12, 3  ;;  %vm232_vm0 = vcmask 130048   ;;  %v200_v2 = vld [vmem:[%s1695_s8] sm:$0xff]  ;;  %v201_v9 = vld [vmem:[%s1695_s8 + $0x8] sm:$0xff]  ;;  %v1546_v40 = vmov 0.0|0.0  }
  0x40   : > { %1187 = vmatprep.mubr.msk.f32.mxu1 %vm232_vm0, %v200_v2  ;;  %v202_v10 = vld [vmem:[%s1695_s8 + $0x10] sm:$0xff]  ;;  %v203_v14 = vld [vmem:[%s1695_s8 + $0x18] sm:$0xff]  ;;  %v204_v15 = vld [vmem:[%s1695_s8 + $0x20] sm:$0xff]  ;;  %1306 = vmatprep.subr.bf16.mxu0 %v1546_v40  ;;  %vm1547_vm1 = vmmov 0   ;;  %v1548_v41 = vmov 0.0   ;;  %s1109_s24 = sshll.u32 %s1691_s4, 3 }
  0x41   : > { %s196_s7 = scalar_select %p195_p9, %s1525_s12, 3  ;;  %v205_v19 = vld [vmem:[%s1695_s8 + $0x28] sm:$0xff]  ;;  %v206_v20 = vld [vmem:[%s1695_s8 + $0x30] sm:$0xff]  ;;  %v207_v24 = vld [vmem:[%s1695_s8 + $0x38] sm:$0xff]  ;;  %1271 = vmatprep.mubr.msk.f32.mxu0 %vm1547_vm1, %v1548_v41  ;;  %vm983_vm2 = vcmask 64512  }
  0x42   : > { %v208_v25 = vld [vmem:[%s1695_s8 + $0x40] sm:$0xff]  ;;  %v209_v29 = vld [vmem:[%s1695_s8 + $0x48] sm:$0xff]  ;;  %v210_v30 = vld [vmem:[%s1695_s8 + $0x50] sm:$0xff]  ;;  %s1129_s17 = sshll.u32 %s1529_s13, 2  ;;  %s194_s3 = scalar_lea.vmem [#allocation5], %s1109_s24 }
  0x43   : > { %s1133_s18 = sshll.u32 %s196_s7, 7  ;;  %v211_v34 = vld [vmem:[%s1695_s8 + $0x58] sm:$0xff]  ;;  %v212_v35 = vld [vmem:[%s1695_s8 + $0x60] sm:$0xff]  ;;  %v213_v37 = vld [vmem:[%s1695_s8 + $0x68] sm:$0xff]  ;;  %s997_s22 = sadd.s32 %s1525_s12, %s1129_s17 }
  0x44   : > { %s1706_s29 = scalar_lea.vmem %s1817_s1, %s1133_s18  ;;  %v214_v38 = vld [vmem:[%s1695_s8 + $0x70] sm:$0xff]  ;;  %v215_v39 = vld [vmem:[%s1695_s8 + $0x78] sm:$0xff]  ;;  %s1130_s26 = sshll.u32 %s997_s22, 7 }
  0x45   : > { %v216_v0 = vld [vmem:[%s1706_s29] sm:$0xff]  ;;  %v217_v1 = vld [vmem:[%s1706_s29 + $0x8] sm:$0xff]  ;;  %v218_v4 = vld [vmem:[%s1706_s29 + $0x10] sm:$0xff]  ;;  %s1001_s23 = sshll.u32 %s194_s3, 4  ;;  %s1762_s8 = scalar_lea.hbm %s1818_s2, %s1130_s26  ;;  %s1764_s23 = int_to_ptr.vmem [resolvable:$true] %s1001_s23 }
  0x46   : > { %v1274_v3 = vpack.c.bf16 %v217_v1, %v216_v0  ;;  %v219_v5 = vld [vmem:[%s1706_s29 + $0x18] sm:$0xff]  ;;  %881 = vxpose.xlu0.b32.start [1/16] (narrow) %v216_v0, 8  ;;  %v220_v7 = vld [vmem:[%s1706_s29 + $0x20] sm:$0xff]  ;;  %v221_v8 = vld [vmem:[%s1706_s29 + $0x28] sm:$0xff]  ;;  %s986_s7 = scalar_lea.sflag [#allocation4], %s1691_s4  ;;  %s1443_s13 = scalar_lea.vmem %s1764_s23, 128 }
  0x47   : > { %v1278_v6 = vpack.c.bf16 %v219_v5, %v218_v4  ;;  %v1282_v11 = vpack.c.bf16 %v221_v8, %v220_v7  ;;  %v222_v12 = vld [vmem:[%s1706_s29 + $0x30] sm:$0xff]  ;;  %v223_v13 = vld [vmem:[%s1706_s29 + $0x38] sm:$0xff]  ;;  %v224_v17 = vld [vmem:[%s1706_s29 + $0x40] sm:$0xff]  ;;  %p1444_p8 = scmp.ne.s32.totalorder %s1764_s23, %s1443_s13  ;;  %p1825_p12 = scmp.ne.s32.totalorder %s1822_s25, 0 }
  0x48   : > { %1275 = vmatprep.subr.bf16.mxu1 %v1274_v3  ;;  %v1286_v16 = vpack.c.bf16 %v223_v13, %v222_v12  ;;  %v225_v18 = vld [vmem:[%s1706_s29 + $0x48] sm:$0xff]  ;;  %v226_v22 = vld [vmem:[%s1706_s29 + $0x50] sm:$0xff]  ;;  %v227_v23 = vld [vmem:[%s1706_s29 + $0x58] sm:$0xff]  ;;  %s1549_s12 = smov [#allocation5]  }
  0x49   : > { %1277 = vmatpush3.bf16.msra.mxu1 %v1274_v3  ;;  %v1290_v21 = vpack.c.bf16 %v225_v18, %v224_v17  ;;  %v1294_v26 = vpack.c.bf16 %v227_v23, %v226_v22  ;;  %v228_v27 = vld [vmem:[%s1706_s29 + $0x60] sm:$0xff]  ;;  %v229_v28 = vld [vmem:[%s1706_s29 + $0x68] sm:$0xff]  ;;  %v230_v32 = vld [vmem:[%s1706_s29 + $0x70] sm:$0xff]  ;;  %p1445_p0 = pnand %p1444_p8, %p1825_p12  ;;  %s1447_s18 = sshll.u32 %s1549_s12, 4  ;;  %s1448_s18 = int_to_ptr.vmem [resolvable:$false] %s1447_s18 }
  0x4a   : > { %1279 = vmatprep.subr.bf16.mxu1 %v1278_v6  ;;  %882 = vxpose.xlu0.b32.cont [2/16] (narrow) %v217_v1, 8  ;;  %v1298_v31 = vpack.c.bf16 %v229_v28, %v228_v27  ;;  %v231_v33 = vld [vmem:[%s1706_s29 + $0x78] sm:$0xff]  ;;  %s1449_s21 = scalar_lea.vmem %s1448_s18, 256  ;;  %p1450_p13 = scmp.lt.s32.totalorder %s1764_s23, %s1448_s18 }
  0x4b   : > { %v1302_v36 = vpack.c.bf16 %v231_v33, %v230_v32  ;;  %p1446_p11 = pneg %p1445_p0  ;;  %p1451_p1 = scmp.lt.s32.totalorder %s1449_s21, %s1443_s13 }
  0x4c   : > { %1188 = vmatmul.mubr.msk.f32.vlgmr.msra.gmra.mrb[0].mxu1 %vm232_vm0, %v201_v9 }
  0x4d   : > { %1281 = vmatpush3.bf16.msra.mxu1 %v1278_v6  ;;  %1194 = vmatprep.mubr.msk.f32.mxu1 %vm232_vm0, %v202_v10  ;;  %p1452_p3 = por %p1451_p1, %p1450_p13 }
  0x4e   : > { %1283 = vmatprep.subr.bf16.mxu1 %v1282_v11  ;;  %883 = vxpose.xlu0.b32.cont [3/16] (narrow) %v218_v4, 8 }
  0x4f   : > { %p1453_p5 = pnand %p1452_p3, %p1446_p11 }
  0x50   : > { %1195 = vmatmul.mubr.msk.f32.vlgmr.msra.gmra.mrb[2].mxu1 %vm232_vm0, %v203_v14 }
  0x51   : > { %1285 = vmatpush3.bf16.msra.mxu1 %v1282_v11  ;;  %1201 = vmatprep.mubr.msk.f32.mxu1 %vm232_vm0, %v204_v15 }
  0x52   : > { %1287 = vmatprep.subr.bf16.mxu1 %v1286_v16  ;;  %884 = vxpose.xlu0.b32.cont [4/16] (narrow) %v219_v5, 8 }
  0x54   : > { %1202 = vmatmul.mubr.msk.f32.vlgmr.msra.gmra.mrb[4].mxu1 %vm232_vm0, %v205_v19 }
  0x55   : > { %1289 = vmatpush3.bf16.msra.mxu1 %v1286_v16  ;;  %1208 = vmatprep.mubr.msk.f32.mxu1 %vm232_vm0, %v206_v20 }
  0x56   : > { %1291 = vmatprep.subr.bf16.mxu1 %v1290_v21  ;;  %885 = vxpose.xlu0.b32.cont [5/16] (narrow) %v220_v7, 8 }
  0x58   : > { %1209 = vmatmul.mubr.msk.f32.vlgmr.msra.gmra.mrb[6].mxu1 %vm232_vm0, %v207_v24 }
  0x59   : > { %1293 = vmatpush3.bf16.msra.mxu1 %v1290_v21  ;;  %1215 = vmatprep.mubr.msk.f32.mxu1 %vm232_vm0, %v208_v25 }
  0x5a   : > { %1295 = vmatprep.subr.bf16.mxu1 %v1294_v26  ;;  %886 = vxpose.xlu0.b32.cont [6/16] (narrow) %v221_v8, 8 }
  0x5c   : > { %1216 = vmatmul.mubr.msk.f32.vlgmr.msra.gmra.mrb[8].mxu1 %vm232_vm0, %v209_v29 }
  0x5d   : > { %1297 = vmatpush3.bf16.msra.mxu1 %v1294_v26  ;;  %1222 = vmatprep.mubr.msk.f32.mxu1 %vm232_vm0, %v210_v30 }
  0x5e   : > { %1299 = vmatprep.subr.bf16.mxu1 %v1298_v31  ;;  %887 = vxpose.xlu0.b32.cont [7/16] (narrow) %v222_v12, 8 }
  0x60   : > { %1223 = vmatmul.mubr.msk.f32.vlgmr.msra.gmra.mrb[10].mxu1 %vm232_vm0, %v211_v34 }
  0x61   : > { %1301 = vmatpush3.bf16.msra.mxu1 %v1298_v31  ;;  %1229 = vmatprep.mubr.msk.f32.mxu1 %vm232_vm0, %v212_v35 }
  0x62   : > { %1303 = vmatprep.subr.bf16.mxu1 %v1302_v36  ;;  %888 = vxpose.xlu0.b32.cont [8/16] (narrow) %v223_v13, 8 }
  0x64   : > { %1230 = vmatmul.mubr.msk.f32.vlgmr.msra.gmra.mrb[12].mxu1 %vm232_vm0, %v213_v37 }
  0x65   : > { %1305 = vmatpush3.bf16.msra.mxu1 %v1302_v36  ;;  %1236 = vmatprep.mubr.msk.f32.mxu1 %vm232_vm0, %v214_v38 }
  0x66   : > { %889 = vxpose.xlu0.b32.cont [9/16] (narrow) %v224_v17, 8 }
  0x68   : > { %1237 = vmatmul.mubr.msk.f32.vlgmr.msra.gmra.mrb[14].mxu1 %vm232_vm0, %v215_v39 }
  0x6a   : > { %890 = vxpose.xlu0.b32.cont [10/16] (narrow) %v225_v18, 8 }
  0x6e   : > { %891 = vxpose.xlu0.b32.cont [11/16] (narrow) %v226_v22, 8 }
  0x72   : > { %892 = vxpose.xlu0.b32.cont [12/16] (narrow) %v227_v23, 8 }
  0x76   : > { %893 = vxpose.xlu0.b32.cont [13/16] (narrow) %v228_v27, 8 }
  0x7a   : > { %894 = vxpose.xlu0.b32.cont [14/16] (narrow) %v229_v28, 8 }
  0x7e   : > { %895 = vxpose.xlu0.b32.cont [15/16] (narrow) %v230_v32, 8 }
  0x82   : > { %896 = vxpose.xlu0.b32.end [16/16] (narrow) %v231_v33, 8 }
  0xc6   : > { %v897_v2 = vpop.trf.xlu0 }
 0x11f   : > { %v1189_v42 = vpop.f32.mrb[0].mxu1 }
 0x120   : > { %v305_v43 = vpop.f32.mrb[1].mxu1 }
 0x121   : > { %v1307_v44 = vpack.c.bf16 %v1189_v42, %v305_v43 }
 0x123   : > { %v1196_v45 = vpop.f32.mrb[2].mxu1  ;;  %1308 = vmatpush3.bf16.msra.mxu0 %v1307_v44 }
 0x124   : > { %v386_v46 = vpop.f32.mrb[3].mxu1  ;;  %1309 = vmatprep.subr.bf16.mxu0 %v1546_v40 }
 0x125   : > { %v1310_v47 = vpack.c.bf16 %v1196_v45, %v386_v46 }
 0x127   : > { %v1203_v48 = vpop.f32.mrb[4].mxu1  ;;  %1311 = vmatpush3.bf16.msra.mxu0 %v1310_v47 }
 0x128   : > { %v467_v49 = vpop.f32.mrb[5].mxu1  ;;  %1312 = vmatprep.subr.bf16.mxu0 %v1546_v40 }
 0x129   : > { %v1313_v50 = vpack.c.bf16 %v1203_v48, %v467_v49 }
 0x12b   : > { %v1210_v51 = vpop.f32.mrb[6].mxu1  ;;  %1314 = vmatpush3.bf16.msra.mxu0 %v1313_v50 }
 0x12c   : > { %v548_v52 = vpop.f32.mrb[7].mxu1  ;;  %1315 = vmatprep.subr.bf16.mxu0 %v1546_v40 }
 0x12d   : > { %v1316_v53 = vpack.c.bf16 %v1210_v51, %v548_v52 }
 0x12f   : > { %v1217_v54 = vpop.f32.mrb[8].mxu1  ;;  %1317 = vmatpush3.bf16.msra.mxu0 %v1316_v53 }
 0x130   : > { %v629_v55 = vpop.f32.mrb[9].mxu1  ;;  %1318 = vmatprep.subr.bf16.mxu0 %v1546_v40 }
 0x131   : > { %v1319_v56 = vpack.c.bf16 %v1217_v54, %v629_v55 }
 0x133   : > { %v1224_v57 = vpop.f32.mrb[10].mxu1  ;;  %1320 = vmatpush3.bf16.msra.mxu0 %v1319_v56 }
 0x134   : > { %v710_v58 = vpop.f32.mrb[11].mxu1  ;;  %1321 = vmatprep.subr.bf16.mxu0 %v1546_v40 }
 0x135   : > { %v1322_v59 = vpack.c.bf16 %v1224_v57, %v710_v58 }
 0x137   : > { %v1231_v60 = vpop.f32.mrb[12].mxu1  ;;  %1323 = vmatpush3.bf16.msra.mxu0 %v1322_v59 }
 0x138   : > { %v791_v61 = vpop.f32.mrb[13].mxu1  ;;  %1324 = vmatprep.subr.bf16.mxu0 %v1546_v40 }
 0x139   : > { %v1325_v62 = vpack.c.bf16 %v1231_v60, %v791_v61 }
 0x13b   : > { %v1238_v63 = vpop.f32.mrb[14].mxu1  ;;  %1326 = vmatpush3.bf16.msra.mxu0 %v1325_v62 }
 0x13c   : > { %v872_v0 = vpop.f32.mrb[15].mxu1  ;;  %1327 = vmatprep.subr.bf16.mxu0 %v1546_v40 }
 0x13d   : > { %v1328_v1 = vpack.c.bf16 %v1238_v63, %v872_v0 }
 0x13f   : > { %1329 = vmatpush3.bf16.msra.mxu0 %v1328_v1 }
 0x142   : > { %1272 = vmatmul.mubr.f32.vlgmr.msra.gmra.mrb[0].mxu0 %v897_v2 }
 0x215   : > { %v979_v3 = vpop.f32.mrb[0].mxu0 }
 0x216   : > { %984 = vst.msk [vmem:[%s194_s3] sm:$0xff] %vm983_vm2, %v979_v3  ;;  %v1273_v4 = vpop.f32.mrb[1].mxu0 }
 0x217   : > { %1456 = shalt.err (!%p1453_p5)
}
 0x218   : > { %s1457_s4 = scalar_lea.hbm %s1762_s8, 128  ;;  %s1461_s24 = scalar_lea.hbm %s1818_s2, 1024 }
 0x219   : > { %p1458_p6 = scmp.ne.s32.totalorder %s1762_s8, %s1457_s4  ;;  %p1462_p4 = scmp.lt.u32.totalorder %s1762_s8, %s1818_s2 }
 0x21a   : > { %p1463_p10 = scmp.lt.u32.totalorder %s1461_s24, %s1457_s4  ;;  %p1465_p8 = scmp.lt.u32.totalorder %s1457_s4, %s1762_s8 }
 0x21b   : > { %p1459_p7 = pnand %p1458_p6, %p1825_p12 }
 0x21c   : > { %p1464_p9 = por %p1463_p10, %p1462_p4 }
 0x21d   : > { %p1460_p2 = pneg %p1459_p7 }
 0x21e   : > { %p1466_p0 = por %p1465_p8, %p1464_p9 }
 0x220   : > { %p1467_p11 = pnand %p1466_p0, %p1460_p2 }
 0x222   : > { %1470 = shalt.err (!%p1467_p11)
}
 0x223   : > { %1332 = dma.vmem_to_hbm [thread:$0]  (%p1825_p12), %s1764_s23, 128, %s1762_s8, %s986_s7  }
 0x224 PF: > { %p1343_p13 = scmp.ge.s32.totalorder %s1541_s16, 2  ;;  %s1013_s26 = sand.u32 1, %s1513_s9  }
 0x225   : > { %p1826_p1 = scmp.ne.s32.totalorder %s1823_s28, 0  ;;  %s1014_s3 = scalar_lea.sflag [#allocation4], %s1013_s26 }
 0x227   : > { %p1339_p3 = pnand %p1343_p13, %p1826_p1 }
 0x229   : > { %1508 = dma.done.wait (!%p1339_p3), %s1014_s3, 128  }
 0x22a   : > { %1510 = vsyncadd (!%p1339_p3), %s1014_s3, 4294967168  ;;  %s18_s16 = sadd.s32 1, %s1541_s16   ;;  %s1827_s9 = smov %s1517_s10 }
 0x22b   : > { %p15_p5 = scmp.ge.s32.totalorder %s18_s16, 10   ;;  %s1828_s10 = smov %s1521_s11 }
 0x22c   : > { %s1829_s11 = smov %s1643_s30  ;;  %s1830_s12 = smov %s1533_s14 }
 0x22d   : > { %s1831_s13 = smov %s1537_s15  ;;  %s1832_s14 = smov %s1835_s19 }
 0x22e   : > { %s1833_s15 = smov %s1839_s20  ;;  %17 = sbr.rel (!%p15_p5) target bundleno = 7 (0x7), region = 76 }
 0x235   :  { %1019 = vsyncpa [#allocation3], 1 }
 0x236   :  { %1021 = vsyncpa [#allocation3 + $0x1], 1 }
 0x237   :  { %1022 = vsyncpa [#allocation4], 1 }
 0x238   :  { %1024 = vsyncpa [#allocation4 + $0x1], 1 }

</bundles_post_ra>
